<compile_context>
chip_gen: v6e
topology: v6e:2x2x1
jax: 0.10.0
libtpu: 0.0.40
codegen_flags: <defaults>
</compile_context>

<pallas_src>
import functools
import math

import jax
import jax.numpy as jnp
from jax.experimental import pallas as pl
from jax.experimental.pallas import tpu as pltpu

_MIB = 1024 * 1024
# Below ~1 KiB per contiguous run the HBM->HBM DMA path becomes
# descriptor-bound; route those cases through the lane-dense VMEM path.
_DMA_MIN_RUN_BYTES = 1024


def _round_up(x, m):
    return ((x + m - 1) // m) * m


def _vmem_budget_bytes():
    """Returns (block-sizing budget incl. double buffers, vmem_limit_bytes)."""
    phys = 64 * _MIB  # conservative default = v7x per-TC physical VMEM
    try:
        phys = int(getattr(pltpu.get_tpu_info(), "vmem_capacity_bytes", phys))
    except Exception:  # interpret mode / older runtimes: keep the default
        pass
    budget = min(32 * _MIB, phys // 2)                      # sizes the blocks
    vmem_limit = min(phys - 16 * _MIB, budget + 16 * _MIB)  # scoped-VMEM raise
    return budget, vmem_limit


# ---------------------------------------------------------------------------
# Path A: direct strided HBM->HBM DMA per input (no VMEM bounce).
# ---------------------------------------------------------------------------
def _concat_dma_kernel(x1_hbm, x2_hbm, o_hbm, sem, *, c1, c2):
    cp1 = pltpu.make_async_copy(x1_hbm, o_hbm.at[:, pl.ds(0, c1)], sem.at[0])
    cp2 = pltpu.make_async_copy(x2_hbm, o_hbm.at[:, pl.ds(c1, c2)], sem.at[1])
    cp1.start()
    cp2.start()
    cp1.wait()
    cp2.wait()


def _concat_dma(x1f, x2f, c1, c2):
    outer = x1f.shape[0]
    kernel = functools.partial(_concat_dma_kernel, c1=c1, c2=c2)
    return pl.pallas_call(
        kernel,
        out_shape=jax.ShapeDtypeStruct((outer, c1 + c2), x1f.dtype),
        in_specs=[
            pl.BlockSpec(memory_space=pl.ANY),
            pl.BlockSpec(memory_space=pl.ANY),
        ],
        out_specs=pl.BlockSpec(memory_space=pl.ANY),
        scratch_shapes=[pltpu.SemaphoreType.DMA((2,))],
        compiler_params=pltpu.CompilerParams(has_side_effects=True),
    )(x1f, x2f)


# ---------------------------------------------------------------------------
# Path B: gridded, pipelined VMEM copy over the outer axis (lane-dense output).
# ---------------------------------------------------------------------------
def _concat_vmem_kernel(x1_ref, x2_ref, o_ref, *, c1):
    # Two slab stores into the lane-dense output block.  After flattening the
    # trailing dims, c1 is a multiple of 128 in the common cases so both
    # stores are unmasked full-lane vst.
    # TODO(synk): for lane-misaligned c1, a single
    #   o_ref[...] = jnp.concatenate([x1, x2], -1) store may beat two masked
    #   stores on v5e; keeping the two-store form that is verified to lower.
    o_ref[:, :c1] = x1_ref[...]
    o_ref[:, c1:] = x2_ref[...]


def _concat_vmem(x1f, x2f, c1, c2, sub, budget, vmem_limit):
    outer = x1f.shape[0]
    itemsize = jnp.dtype(x1f.dtype).itemsize
    # bytes per outer row per grid step: (x1 + x2 + out) x double buffering
    row_bytes = 4 * (c1 + c2) * itemsize
    max_rows = (budget // row_bytes) // sub * sub  # >= sub guaranteed by dispatch
    t_outer = min(outer, max_rows)
    # Keep at least a few grid steps when possible so the HBM prefetch /
    # writeback pipeline stays active and multi-TC chips (v7x) can shard the
    # outer axis across cores.
    if outer > sub:
        t_outer = min(t_outer, max(sub, _round_up(pl.cdiv(outer, 4), sub)))

    grid = (pl.cdiv(outer, t_outer),)
    kernel = functools.partial(_concat_vmem_kernel, c1=c1)
    return pl.pallas_call(
        kernel,
        out_shape=jax.ShapeDtypeStruct((outer, c1 + c2), x1f.dtype),
        grid=grid,
        in_specs=[
            pl.BlockSpec((t_outer, c1), lambda i: (i, 0)),
            pl.BlockSpec((t_outer, c2), lambda i: (i, 0)),
        ],
        out_specs=pl.BlockSpec((t_outer, c1 + c2), lambda i: (i, 0)),
        compiler_params=pltpu.CompilerParams(
            dimension_semantics=("parallel",),
            vmem_limit_bytes=vmem_limit,
        ),
    )(x1f, x2f)


def pallas_concat(x1, x2, dim):
    """torch.cat((x1, x2), dim) implemented with Pallas TPU kernels."""
    nd = x1.ndim
    if dim < 0:
        dim += nd
    assert 0 <= dim < nd, f"invalid dim {dim} for rank {nd}"
    assert x1.dtype == x2.dtype
    for i in range(nd):
        if i != dim:
            assert x1.shape[i] == x2.shape[i], (x1.shape, x2.shape, dim)

    out_shape = tuple(
        x1.shape[i] + x2.shape[i] if i == dim else x1.shape[i] for i in range(nd)
    )
    if x1.size == 0 or x2.size == 0:
        # Degenerate empty operand: nothing to move.
        return jnp.concatenate((x1, x2), axis=dim)

    n1, n2 = x1.shape[dim], x2.shape[dim]
    outer = math.prod(x1.shape[:dim])
    inner = math.prod(x1.shape[dim + 1:])
    c1, c2 = n1 * inner, n2 * inner
    itemsize = jnp.dtype(x1.dtype).itemsize

    # Free, contiguous flattening: every concat becomes a 2-D last-axis concat.
    x1f = x1.reshape(outer, c1)
    x2f = x2.reshape(outer, c2)

    budget, vmem_limit = _vmem_budget_bytes()
    sub = max(8, 32 // itemsize)  # packed sublane tile: 8 f32 / 16 bf16 / 32 i8
    row_bytes = 4 * (c1 + c2) * itemsize
    min_run = min(c1, c2) * itemsize

    use_dma = (
        outer == 1                          # each input is one contiguous slab
        or min_run >= _DMA_MIN_RUN_BYTES    # large runs: DMA streams at roofline
        or budget // row_bytes < sub        # rows too wide to tile in VMEM
    )
    if use_dma:
        out2d = _concat_dma(x1f, x2f, c1, c2)
    else:
        out2d = _concat_vmem(x1f, x2f, c1, c2, sub, budget, vmem_limit)
    return out2d.reshape(out_shape)


if __name__ == "__main__":
    key = jax.random.PRNGKey(0)
    k1, k2 = jax.random.split(key)

    # Small NCHW-like inputs.
    x1 = jax.random.normal(k1, (2, 4, 16, 16), dtype=jnp.float32)
    x2 = jax.random.normal(k2, (2, 4, 16, 16), dtype=jnp.float32)

    # Channel concat (dim=1): large contiguous runs -> HBM->HBM DMA path.
    out = pallas_concat(x1, x2, dim=1)
    jax.block_until_ready(out)
    assert out.shape == (2, 8, 16, 16), out.shape
    assert jnp.array_equal(out, jnp.concatenate((x1, x2), axis=1)), "dim=1 mismatch"

    # Last-axis concat (dim=-1): small runs -> gridded VMEM path.
    out_last = pallas_concat(x1, x2, dim=-1)
    jax.block_until_ready(out_last)
    assert jnp.array_equal(out_last, jnp.concatenate((x1, x2), axis=-1)), "dim=-1 mismatch"

    # Batch concat (dim=0): one fully contiguous slab per input -> DMA path.
    out0 = pallas_concat(x1, x2, dim=0)
    jax.block_until_ready(out0)
    assert jnp.array_equal(out0, jnp.concatenate((x1, x2), axis=0)), "dim=0 mismatch"

    # Second-minor concat (dim=2), f32: 1 KiB runs -> DMA path.
    out2 = pallas_concat(x1, x2, dim=2)
    jax.block_until_ready(out2)
    assert jnp.array_equal(out2, jnp.concatenate((x1, x2), axis=2)), "dim=2 mismatch"

    # Second-minor concat in bf16: small runs -> flattened, lane-dense VMEM
    # path (also exercises dtype-aware sublane tiling).
    x1b = x1.astype(jnp.bfloat16)
    x2b = x2.astype(jnp.bfloat16)
    out2b = pallas_concat(x1b, x2b, dim=2)
    jax.block_until_ready(out2b)
    assert jnp.array_equal(out2b, jnp.concatenate((x1b, x2b), axis=2)), "bf16 dim=2 mismatch"

    print("KERNEL_OK")
</pallas_src>

<mosaic_0001>
module attributes {stable_mosaic.version = 11 : i64} {
  func.func @_concat_dma_kernel(%arg0: memref<2x1024xf32, #tpu.memory_space<any>>, %arg1: memref<2x1024xf32, #tpu.memory_space<any>>, %arg2: memref<2x2048xf32, #tpu.memory_space<any>>, %arg3: memref<2x!tpu.dma_semaphore, #tpu.memory_space<semaphore_mem>>) attributes {dimension_semantics = [], scalar_prefetch = 0 : i64, scratch_operands = 1 : i64, tpu.core_type = #tpu.core_type<tc>} {
    %c0_i32 = arith.constant 0 : i32
    %c0_i32_0 = arith.constant 0 : i32
    %c0_i32_1 = arith.constant 0 : i32
    %0 = tpu.memref_slice %arg2[%c0_i32_0, %c0_i32_1] : memref<2x2048xf32, #tpu.memory_space<any>> -> memref<2x1024xf32, #tpu.memory_space<any>>
    %1 = tpu.memref_slice %arg3[%c0_i32] : memref<2x!tpu.dma_semaphore, #tpu.memory_space<semaphore_mem>> -> memref<1x!tpu.dma_semaphore, #tpu.memory_space<semaphore_mem>>
    %2 = tpu.memref_squeeze %1 : memref<1x!tpu.dma_semaphore, #tpu.memory_space<semaphore_mem>> -> memref<!tpu.dma_semaphore, #tpu.memory_space<semaphore_mem>>
    tpu.enqueue_dma source(%arg0 : memref<2x1024xf32, #tpu.memory_space<any>>) target(%0 : memref<2x1024xf32, #tpu.memory_space<any>>) target_semaphore(%2 : memref<!tpu.dma_semaphore, #tpu.memory_space<semaphore_mem>>)
    %c1_i32 = arith.constant 1 : i32
    %c0_i32_2 = arith.constant 0 : i32
    %c1024_i32 = arith.constant 1024 : i32
    %3 = tpu.memref_slice %arg2[%c0_i32_2, %c1024_i32] : memref<2x2048xf32, #tpu.memory_space<any>> -> memref<2x1024xf32, #tpu.memory_space<any>>
    %4 = tpu.memref_slice %arg3[%c1_i32] : memref<2x!tpu.dma_semaphore, #tpu.memory_space<semaphore_mem>> -> memref<1x!tpu.dma_semaphore, #tpu.memory_space<semaphore_mem>>
    %5 = tpu.memref_squeeze %4 : memref<1x!tpu.dma_semaphore, #tpu.memory_space<semaphore_mem>> -> memref<!tpu.dma_semaphore, #tpu.memory_space<semaphore_mem>>
    tpu.enqueue_dma source(%arg1 : memref<2x1024xf32, #tpu.memory_space<any>>) target(%3 : memref<2x1024xf32, #tpu.memory_space<any>>) target_semaphore(%5 : memref<!tpu.dma_semaphore, #tpu.memory_space<semaphore_mem>>)
    %c0_i32_3 = arith.constant 0 : i32
    %c0_i32_4 = arith.constant 0 : i32
    %c0_i32_5 = arith.constant 0 : i32
    %6 = tpu.memref_slice %arg2[%c0_i32_4, %c0_i32_5] : memref<2x2048xf32, #tpu.memory_space<any>> -> memref<2x1024xf32, #tpu.memory_space<any>>
    %7 = tpu.memref_slice %arg3[%c0_i32_3] : memref<2x!tpu.dma_semaphore, #tpu.memory_space<semaphore_mem>> -> memref<1x!tpu.dma_semaphore, #tpu.memory_space<semaphore_mem>>
    %8 = tpu.memref_squeeze %7 : memref<1x!tpu.dma_semaphore, #tpu.memory_space<semaphore_mem>> -> memref<!tpu.dma_semaphore, #tpu.memory_space<semaphore_mem>>
    tpu.wait_dma2 semaphore(%8 : memref<!tpu.dma_semaphore, #tpu.memory_space<semaphore_mem>>) src(%arg0 : memref<2x1024xf32, #tpu.memory_space<any>>) dst(%6 : memref<2x1024xf32, #tpu.memory_space<any>>)
    %c1_i32_6 = arith.constant 1 : i32
    %c0_i32_7 = arith.constant 0 : i32
    %c1024_i32_8 = arith.constant 1024 : i32
    %9 = tpu.memref_slice %arg2[%c0_i32_7, %c1024_i32_8] : memref<2x2048xf32, #tpu.memory_space<any>> -> memref<2x1024xf32, #tpu.memory_space<any>>
    %10 = tpu.memref_slice %arg3[%c1_i32_6] : memref<2x!tpu.dma_semaphore, #tpu.memory_space<semaphore_mem>> -> memref<1x!tpu.dma_semaphore, #tpu.memory_space<semaphore_mem>>
    %11 = tpu.memref_squeeze %10 : memref<1x!tpu.dma_semaphore, #tpu.memory_space<semaphore_mem>> -> memref<!tpu.dma_semaphore, #tpu.memory_space<semaphore_mem>>
    tpu.wait_dma2 semaphore(%11 : memref<!tpu.dma_semaphore, #tpu.memory_space<semaphore_mem>>) src(%arg1 : memref<2x1024xf32, #tpu.memory_space<any>>) dst(%9 : memref<2x1024xf32, #tpu.memory_space<any>>)
    return
  }
}

</mosaic_0001>

<bundles_post_ra>
// kernel: tpu_custom_call.1
= control target key start
LH: loop header
LB: loop body
LE: loop exit
PB: predicated region body
PF: predicated region fallthrough
CT: control target
= control target key end

     0   :  { %s52_s12 = smov [#allocation2]   ;;  %s53_s13 = smov 131072   ;;  %s83_s0 = inlined_call_operand.hbm [shape: f32[2,1024], index: 0, kind: input, shape index: {}]   ;;  %s84_s2 = inlined_call_operand.hbm [shape: f32[2,2048], index: 2, kind: output, shape index: {}]   ;;  %s85_s1 = inlined_call_operand.hbm [shape: f32[2,1024], index: 1, kind: input, shape index: {}]  }
   0x1   :  { %s14_s11 = scalar_lea.hbm %s84_s2, 256  ;;  %s54_s14 = smov 0  }
   0x2   :  { %13 = dma.general %s83_s0, 256, %s84_s2, %s52_s12, %s53_s13, [#allocation4], %s54_s14, 0  }
   0x3   :  { %s55_s19 = smov [#allocation2 + $0x1]  }
   0x4   :  { %22 = dma.general %s85_s1, 256, %s14_s11, %s55_s19, %s53_s13, [#allocation6], %s54_s14, 0  }
   0x5   :  { %48 = dma.done.wait [#allocation2], 256 }
   0x6   :  { %49 = vsyncadd [#allocation2], 4294967040 }
   0x7   :  { %50 = dma.done.wait [#allocation2 + $0x1], 256 }
   0x8   :  { %51 = vsyncadd [#allocation2 + $0x1], 4294967040 }
   0x9   :  { %29 = vsyncmov [#allocation2] }
   0xc   :  { %s30_s22 = vpop.sfrf %29 }
   0xd   :  { %p42_p0 = scmp.ne.s32.totalorder %s30_s22, 0 }
   0xf   :  { %34 = shalt.err (%p42_p0)  }
  0x10   :  { %36 = vsyncmov [#allocation2 + $0x1] }
  0x13   :  { %s37_s23 = vpop.sfrf %36 }
  0x14   :  { %p43_p1 = scmp.ne.s32.totalorder %s37_s23, 0 }
  0x16   :  { %41 = shalt.err (%p43_p1)  }

</bundles_post_ra>
